<compile_context>
chip_gen: v6e
topology: v6e:2x2x1
jax: 0.10.0
libtpu: 0.0.40
codegen_flags: <defaults>
</compile_context>

<pallas_src>
import functools

import jax
import jax.numpy as jnp
from jax.experimental import pallas as pl
from jax.experimental.pallas import tpu as pltpu


def _round_up(n, m):
    return ((n + m - 1) // m) * m


def _cdiv(a, b):
    return -(-a // b)


def _vmem_cap_bytes():
    # Leave ~25% of physical VMEM for compiler scratch / DMA staging.  Falls back
    # to 48 MiB (75% of the 64 MiB v7x TensorCore) if the query is unavailable.
    try:
        return int(pltpu.get_tpu_info().vmem_capacity_bytes) * 3 // 4
    except Exception:
        return 48 << 20


def _swish(x, alpha, beta):
    # SpookyNet Swish: alpha * x * sigmoid(beta * x) with feature-wise params.
    # sigmoid expressed through a single tanh -> one EUP transcendental per
    # element instead of exp + divide (the 1-wide EUP slot is the binding unit
    # at these sizes, not the MXU).
    return alpha * x * (0.5 * jnp.tanh(0.5 * beta * x) + 0.5)


def residual_mlp_kernel(x_ref,
                        w1_ref, b1_ref, a1_ref, be1_ref,
                        w2_ref, b2_ref, a2_ref, be2_ref,
                        ao_ref, beo_ref, wo_ref, bo_ref,
                        out_ref,
                        *, num_residual):
    """One (block_rows, F_pad) tile of rows; all parameters resident in VMEM.

    Padded-lane invariant: weight/bias/alpha/beta columns beyond the real F are
    zero-padded, so padded lanes stay exactly 0 through every swish
    (alpha=0 -> 0) and every matmul (zero weight columns), and never leak into
    real output columns.  Do not change the padding values without revisiting
    this.
    """
    h = x_ref[...].astype(jnp.float32)

    # num_residual is a small static int -> fully unrolled residual stack.
    for r in range(num_residual):
        t = _swish(h, a1_ref[r], be1_ref[r])
        t = jnp.dot(t.astype(w1_ref.dtype), w1_ref[r],
                    preferred_element_type=jnp.float32) + b1_ref[r]
        t = _swish(t, a2_ref[r], be2_ref[r])
        t = jnp.dot(t.astype(w2_ref.dtype), w2_ref[r],
                    preferred_element_type=jnp.float32) + b2_ref[r]
        h = h + t

    # Output activation + final linear.
    h = _swish(h, ao_ref[...], beo_ref[...])
    y = jnp.dot(h.astype(wo_ref.dtype), wo_ref[...],
                preferred_element_type=jnp.float32) + bo_ref[...]
    out_ref[...] = y.astype(out_ref.dtype)


def _const_spec(shape):
    """Whole-array block, same block every grid step (resident parameters).

    TODO(synk): for very large F request pipeline_mode=pl.Buffered(1) so the
    resident weights are single-buffered instead of double-buffered.
    """
    n = len(shape)
    return pl.BlockSpec(shape, lambda i, _n=n: (0,) * _n)


def _build_call(n_pad, f_pad, num_residual, block_rows, weight_dtype, out_dtype):
    kernel = functools.partial(residual_mlp_kernel, num_residual=num_residual)
    n_mm = 2 * num_residual + 1

    flops = 2 * n_pad * f_pad * f_pad * n_mm
    transcendentals = n_pad * f_pad * n_mm                      # one tanh per swish
    weight_bytes = n_mm * f_pad * f_pad * jnp.dtype(weight_dtype).itemsize
    bytes_accessed = weight_bytes + 2 * n_pad * f_pad * 4

    return pl.pallas_call(
        kernel,
        out_shape=jax.ShapeDtypeStruct((n_pad, f_pad), out_dtype),
        grid_spec=pl.GridSpec(
            grid=(n_pad // block_rows,),
            in_specs=[
                pl.BlockSpec((block_rows, f_pad), lambda i: (i, 0)),  # x tile
                _const_spec((num_residual, f_pad, f_pad)),            # W1
                _const_spec((num_residual, 1, f_pad)),                # b1
                _const_spec((num_residual, 1, f_pad)),                # alpha1
                _const_spec((num_residual, 1, f_pad)),                # beta1
                _const_spec((num_residual, f_pad, f_pad)),            # W2
                _const_spec((num_residual, 1, f_pad)),                # b2
                _const_spec((num_residual, 1, f_pad)),                # alpha2
                _const_spec((num_residual, 1, f_pad)),                # beta2
                _const_spec((1, f_pad)),                              # alpha_out
                _const_spec((1, f_pad)),                              # beta_out
                _const_spec((f_pad, f_pad)),                          # Wo
                _const_spec((1, f_pad)),                              # bo
            ],
            out_specs=pl.BlockSpec((block_rows, f_pad), lambda i: (i, 0)),
        ),
        compiler_params=pltpu.CompilerParams(
            dimension_semantics=("parallel",),
            vmem_limit_bytes=_vmem_cap_bytes()),
        cost_estimate=pl.CostEstimate(
            flops=int(flops), transcendentals=int(transcendentals),
            bytes_accessed=int(bytes_accessed)),
    )


def _choose_row_tiling(n_rows, max_block_rows):
    """Row tile: multiple of 16 (bf16 sublane tile), <= max_block_rows, small
    tail padding, and >= 2 grid steps when possible so v7x's two TensorCores
    can each take tiles along the single "parallel" row axis."""
    rows16 = _round_up(max(n_rows, 16), 16)
    max_block_rows = max(16, _round_up(max_block_rows, 16))
    tiles = _cdiv(rows16, max_block_rows)
    if tiles == 1 and rows16 >= 32:
        tiles = 2
    return _round_up(_cdiv(rows16, tiles), 16)


def prepare_params(params, *, weight_dtype=None, max_block_rows=512):
    """One-time parameter preparation (keep OUT of the per-call path):
    zero-pads every parameter to a lane-dense F_pad (multiple of 128) and picks
    the resident-weight dtype against the VMEM budget."""
    R, _, F = params["w1"].shape
    F_pad = _round_up(max(F, 128), 128)

    if weight_dtype is None:
        cap = _vmem_cap_bytes()
        act_bytes = 2 * 2 * max(16, max_block_rows) * F_pad * 4  # x/out tiles, dbl-buffered

        def resident(itemsize):
            # (2R+1) FxF weights + per-feature vectors; default BlockSpec
            # pipelining keeps two copies of each resident.
            return 2 * ((2 * R + 1) * F_pad * F_pad * itemsize
                        + (4 * R + 3) * F_pad * 4)

        margin = 2 << 20
        if resident(4) + act_bytes + margin <= cap:
            # MXU has large slack in this regime -> keep full f32 numerics.
            weight_dtype = jnp.float32
        elif resident(2) + act_bytes + margin <= cap:
            weight_dtype = jnp.bfloat16
        else:
            # TODO(synk): stream / K-tile the weights over a reduction grid axis
            # once (2R+1)*F_pad^2 no longer fits resident in VMEM.
            raise ValueError(
                f"ResidualMLP weights (num_residual={R}, F_pad={F_pad}) do not "
                "fit in the VMEM budget; reduce num_features or add K-tiling.")

    def pad_mat(a):        # (F, F)    -> (F_pad, F_pad)
        return jnp.pad(a, ((0, F_pad - a.shape[0]), (0, F_pad - a.shape[1])))

    def pad_vec(a):        # (1, F)    -> (1, F_pad)
        return jnp.pad(a, ((0, 0), (0, F_pad - a.shape[1])))

    def pad_smat(a):       # (R, F, F) -> (R, F_pad, F_pad)
        return jnp.pad(a, ((0, 0), (0, F_pad - a.shape[1]), (0, F_pad - a.shape[2])))

    def pad_svec(a):       # (R, 1, F) -> (R, 1, F_pad)
        return jnp.pad(a, ((0, 0), (0, 0), (0, F_pad - a.shape[2])))

    return {
        "w1": pad_smat(params["w1"]).astype(weight_dtype),
        "b1": pad_svec(params["b1"]).astype(jnp.float32),
        "a1": pad_svec(params["a1"]).astype(jnp.float32),
        "be1": pad_svec(params["be1"]).astype(jnp.float32),
        "w2": pad_smat(params["w2"]).astype(weight_dtype),
        "b2": pad_svec(params["b2"]).astype(jnp.float32),
        "a2": pad_svec(params["a2"]).astype(jnp.float32),
        "be2": pad_svec(params["be2"]).astype(jnp.float32),
        "ao": pad_vec(params["ao"]).astype(jnp.float32),
        "beo": pad_vec(params["beo"]).astype(jnp.float32),
        "wo": pad_mat(params["wo"]).astype(weight_dtype),
        "bo": pad_vec(params["bo"]).astype(jnp.float32),
    }


@functools.partial(jax.jit, static_argnames=("block_rows",))
def _residual_mlp_padded(x, prep, *, block_rows):
    n, f = x.shape
    f_pad = prep["wo"].shape[-1]
    num_residual = prep["w1"].shape[0]
    n_pad = _round_up(max(n, block_rows), block_rows)

    x_p = jnp.pad(x, ((0, n_pad - n), (0, f_pad - f)))
    call = _build_call(n_pad, f_pad, num_residual, block_rows,
                       prep["w1"].dtype, x.dtype)
    y = call(x_p,
             prep["w1"], prep["b1"], prep["a1"], prep["be1"],
             prep["w2"], prep["b2"], prep["a2"], prep["be2"],
             prep["ao"], prep["beo"], prep["wo"], prep["bo"])
    return y[:n, :f]


def residual_mlp(x, prepared_params, *, max_block_rows=512):
    """Forward pass. `prepared_params` must come from prepare_params()."""
    block_rows = _choose_row_tiling(x.shape[0], max_block_rows)
    return _residual_mlp_padded(x, prepared_params, block_rows=block_rows)


def residual_mlp_reference(x, p):
    """Pure-JAX f32 reference with identical semantics to the PyTorch module."""
    h = x.astype(jnp.float32)
    R = p["w1"].shape[0]
    for r in range(R):
        t = p["a1"][r] * h * jax.nn.sigmoid(p["be1"][r] * h)
        t = t @ p["w1"][r] + p["b1"][r]
        t = p["a2"][r] * t * jax.nn.sigmoid(p["be2"][r] * t)
        t = t @ p["w2"][r] + p["b2"][r]
        h = h + t
    h = p["ao"] * h * jax.nn.sigmoid(p["beo"] * h)
    return (h @ p["wo"] + p["bo"]).astype(x.dtype)


def make_params(key, num_features, num_residual):
    """Deterministic synthetic parameters (shapes match the PyTorch module).

    The real module zero-inits the residual linear2 weights and uses orthogonal
    init elsewhere; here small random values keep the forward path numerically
    non-trivial.  Swish alpha/beta use the module defaults (1.0, 1.702).
    Weights are stored as (in, out) = W_pytorch.T so the kernel computes x @ W.
    """
    F, R = num_features, num_residual
    keys = jax.random.split(key, 4)
    scale = 0.1
    return {
        "w1": scale * jax.random.normal(keys[0], (R, F, F), jnp.float32),
        "b1": jnp.zeros((R, 1, F), jnp.float32),
        "a1": jnp.ones((R, 1, F), jnp.float32),
        "be1": jnp.full((R, 1, F), 1.702, jnp.float32),
        "w2": scale * jax.random.normal(keys[1], (R, F, F), jnp.float32),
        "b2": jnp.zeros((R, 1, F), jnp.float32),
        "a2": jnp.ones((R, 1, F), jnp.float32),
        "be2": jnp.full((R, 1, F), 1.702, jnp.float32),
        "ao": jnp.ones((1, F), jnp.float32),
        "beo": jnp.full((1, F), 1.702, jnp.float32),
        "wo": scale * jax.random.normal(keys[2], (F, F), jnp.float32),
        "bo": jnp.zeros((1, F), jnp.float32),
    }


if __name__ == "__main__":
    N = 16            # number of rows (e.g. atoms)
    F = 32            # num_features (demo-size; kernel is lane-efficient for F >= 128)
    R = 3             # num_residual

    key = jax.random.PRNGKey(0)
    kx, kp = jax.random.split(key)
    x = jax.random.normal(kx, (N, F), jnp.float32)
    params = make_params(kp, F, R)

    prepared = prepare_params(params)          # one-time pad + weight-dtype choice
    out = jax.block_until_ready(residual_mlp(x, prepared))

    ref = residual_mlp_reference(x, params)
    assert out.shape == (N, F)
    # Weights stay f32 at this size; tolerance still allows for MXU pass-splitting
    # of f32 matmuls and the tanh-based sigmoid formulation.
    err = float(jnp.max(jnp.abs(out - ref)))
    assert jnp.allclose(out, ref, atol=2e-2, rtol=2e-2), (
        f"mismatch vs JAX reference; max abs err = {err}")

    print("KERNEL_OK")
</pallas_src>

<mosaic_0001>
module attributes {stable_mosaic.version = 11 : i64} {
  func.func @residual_mlp_kernel(%arg0: i32, %arg1: memref<16x128xf32, #tpu.memory_space<vmem>>, %arg2: memref<3x128x128xf32, #tpu.memory_space<vmem>>, %arg3: memref<3x1x128xf32, #tpu.memory_space<vmem>>, %arg4: memref<3x1x128xf32, #tpu.memory_space<vmem>>, %arg5: memref<3x1x128xf32, #tpu.memory_space<vmem>>, %arg6: memref<3x128x128xf32, #tpu.memory_space<vmem>>, %arg7: memref<3x1x128xf32, #tpu.memory_space<vmem>>, %arg8: memref<3x1x128xf32, #tpu.memory_space<vmem>>, %arg9: memref<3x1x128xf32, #tpu.memory_space<vmem>>, %arg10: memref<1x128xf32, #tpu.memory_space<vmem>>, %arg11: memref<1x128xf32, #tpu.memory_space<vmem>>, %arg12: memref<128x128xf32, #tpu.memory_space<vmem>>, %arg13: memref<1x128xf32, #tpu.memory_space<vmem>>, %arg14: memref<16x128xf32, #tpu.memory_space<vmem>>) attributes {dimension_semantics = [#tpu.dimension_semantics<parallel>], iteration_bounds = array<i64: 1>, scalar_prefetch = 0 : i64, scratch_operands = 0 : i64, tpu.core_type = #tpu.core_type<tc>, window_params = [{transform_indices = @transform_0, window_bounds = array<i64: 16, 128>}, {pipeline_mode = #tpu.pipeline_mode<synchronous>, transform_indices = @transform_1, window_bounds = array<i64: 3, 128, 128>}, {pipeline_mode = #tpu.pipeline_mode<synchronous>, transform_indices = @transform_2, window_bounds = array<i64: 3, 1, 128>}, {pipeline_mode = #tpu.pipeline_mode<synchronous>, transform_indices = @transform_3, window_bounds = array<i64: 3, 1, 128>}, {pipeline_mode = #tpu.pipeline_mode<synchronous>, transform_indices = @transform_4, window_bounds = array<i64: 3, 1, 128>}, {pipeline_mode = #tpu.pipeline_mode<synchronous>, transform_indices = @transform_5, window_bounds = array<i64: 3, 128, 128>}, {pipeline_mode = #tpu.pipeline_mode<synchronous>, transform_indices = @transform_6, window_bounds = array<i64: 3, 1, 128>}, {pipeline_mode = #tpu.pipeline_mode<synchronous>, transform_indices = @transform_7, window_bounds = array<i64: 3, 1, 128>}, {pipeline_mode = #tpu.pipeline_mode<synchronous>, transform_indices = @transform_8, window_bounds = array<i64: 3, 1, 128>}, {pipeline_mode = #tpu.pipeline_mode<synchronous>, transform_indices = @transform_9, window_bounds = array<i64: 1, 128>}, {pipeline_mode = #tpu.pipeline_mode<synchronous>, transform_indices = @transform_10, window_bounds = array<i64: 1, 128>}, {pipeline_mode = #tpu.pipeline_mode<synchronous>, transform_indices = @transform_11, window_bounds = array<i64: 128, 128>}, {pipeline_mode = #tpu.pipeline_mode<synchronous>, transform_indices = @transform_12, window_bounds = array<i64: 1, 128>}, {transform_indices = @transform_13, window_bounds = array<i64: 16, 128>}]} {
    %c0 = arith.constant 0 : index
    %c0_0 = arith.constant 0 : index
    %0 = vector.load %arg1[%c0, %c0_0] : memref<16x128xf32, #tpu.memory_space<vmem>>, vector<16x128xf32>
    %c0_1 = arith.constant 0 : index
    %c0_2 = arith.constant 0 : index
    %c0_3 = arith.constant 0 : index
    %1 = vector.load %arg4[%c0_1, %c0_2, %c0_3] : memref<3x1x128xf32, #tpu.memory_space<vmem>>, vector<1x1x128xf32>
    %2 = vector.shape_cast %1 : vector<1x1x128xf32> to vector<1x128xf32>
    %c0_4 = arith.constant 0 : index
    %c0_5 = arith.constant 0 : index
    %c0_6 = arith.constant 0 : index
    %3 = vector.load %arg5[%c0_4, %c0_5, %c0_6] : memref<3x1x128xf32, #tpu.memory_space<vmem>>, vector<1x1x128xf32>
    %4 = vector.shape_cast %3 : vector<1x1x128xf32> to vector<1x128xf32>
    %5 = vector.broadcast %2 : vector<1x128xf32> to vector<16x128xf32>
    %6 = arith.mulf %5, %0 : vector<16x128xf32>
    %cst = arith.constant 5.000000e-01 : f32
    %7 = vector.broadcast %cst : f32 to vector<1x128xf32>
    %8 = arith.mulf %7, %4 : vector<1x128xf32>
    %9 = vector.broadcast %8 : vector<1x128xf32> to vector<16x128xf32>
    %10 = arith.mulf %9, %0 : vector<16x128xf32>
    %11 = math.tanh %10 : vector<16x128xf32>
    %cst_7 = arith.constant 5.000000e-01 : f32
    %12 = vector.broadcast %cst_7 : f32 to vector<16x128xf32>
    %13 = arith.mulf %12, %11 : vector<16x128xf32>
    %cst_8 = arith.constant 5.000000e-01 : f32
    %14 = vector.broadcast %cst_8 : f32 to vector<16x128xf32>
    %15 = arith.addf %13, %14 : vector<16x128xf32>
    %16 = arith.mulf %6, %15 : vector<16x128xf32>
    %c0_9 = arith.constant 0 : index
    %c0_10 = arith.constant 0 : index
    %c0_11 = arith.constant 0 : index
    %17 = vector.load %arg2[%c0_9, %c0_10, %c0_11] : memref<3x128x128xf32, #tpu.memory_space<vmem>>, vector<1x128x128xf32>
    %18 = vector.shape_cast %17 : vector<1x128x128xf32> to vector<128x128xf32>
    %cst_12 = arith.constant dense<0.000000e+00> : vector<16x128xf32>
    %19 = tpu.matmul %16, %18, %cst_12 {dimension_numbers = #tpu.dot_dimension_numbers<[1], [0], [0], [1], [0, 0, 1, 1], [], []>} : vector<16x128xf32>, vector<128x128xf32>, vector<16x128xf32> -> vector<16x128xf32>
    %c0_13 = arith.constant 0 : index
    %c0_14 = arith.constant 0 : index
    %c0_15 = arith.constant 0 : index
    %20 = vector.load %arg3[%c0_13, %c0_14, %c0_15] : memref<3x1x128xf32, #tpu.memory_space<vmem>>, vector<1x1x128xf32>
    %21 = vector.shape_cast %20 : vector<1x1x128xf32> to vector<1x128xf32>
    %22 = vector.broadcast %21 : vector<1x128xf32> to vector<16x128xf32>
    %23 = arith.addf %19, %22 : vector<16x128xf32>
    %c0_16 = arith.constant 0 : index
    %c0_17 = arith.constant 0 : index
    %c0_18 = arith.constant 0 : index
    %24 = vector.load %arg8[%c0_16, %c0_17, %c0_18] : memref<3x1x128xf32, #tpu.memory_space<vmem>>, vector<1x1x128xf32>
    %25 = vector.shape_cast %24 : vector<1x1x128xf32> to vector<1x128xf32>
    %c0_19 = arith.constant 0 : index
    %c0_20 = arith.constant 0 : index
    %c0_21 = arith.constant 0 : index
    %26 = vector.load %arg9[%c0_19, %c0_20, %c0_21] : memref<3x1x128xf32, #tpu.memory_space<vmem>>, vector<1x1x128xf32>
    %27 = vector.shape_cast %26 : vector<1x1x128xf32> to vector<1x128xf32>
    %28 = vector.broadcast %25 : vector<1x128xf32> to vector<16x128xf32>
    %29 = arith.mulf %28, %23 : vector<16x128xf32>
    %cst_22 = arith.constant 5.000000e-01 : f32
    %30 = vector.broadcast %cst_22 : f32 to vector<1x128xf32>
    %31 = arith.mulf %30, %27 : vector<1x128xf32>
    %32 = vector.broadcast %31 : vector<1x128xf32> to vector<16x128xf32>
    %33 = arith.mulf %32, %23 : vector<16x128xf32>
    %34 = math.tanh %33 : vector<16x128xf32>
    %cst_23 = arith.constant 5.000000e-01 : f32
    %35 = vector.broadcast %cst_23 : f32 to vector<16x128xf32>
    %36 = arith.mulf %35, %34 : vector<16x128xf32>
    %cst_24 = arith.constant 5.000000e-01 : f32
    %37 = vector.broadcast %cst_24 : f32 to vector<16x128xf32>
    %38 = arith.addf %36, %37 : vector<16x128xf32>
    %39 = arith.mulf %29, %38 : vector<16x128xf32>
    %c0_25 = arith.constant 0 : index
    %c0_26 = arith.constant 0 : index
    %c0_27 = arith.constant 0 : index
    %40 = vector.load %arg6[%c0_25, %c0_26, %c0_27] : memref<3x128x128xf32, #tpu.memory_space<vmem>>, vector<1x128x128xf32>
    %41 = vector.shape_cast %40 : vector<1x128x128xf32> to vector<128x128xf32>
    %cst_28 = arith.constant dense<0.000000e+00> : vector<16x128xf32>
    %42 = tpu.matmul %39, %41, %cst_28 {dimension_numbers = #tpu.dot_dimension_numbers<[1], [0], [0], [1], [0, 0, 1, 1], [], []>} : vector<16x128xf32>, vector<128x128xf32>, vector<16x128xf32> -> vector<16x128xf32>
    %c0_29 = arith.constant 0 : index
    %c0_30 = arith.constant 0 : index
    %c0_31 = arith.constant 0 : index
    %43 = vector.load %arg7[%c0_29, %c0_30, %c0_31] : memref<3x1x128xf32, #tpu.memory_space<vmem>>, vector<1x1x128xf32>
    %44 = vector.shape_cast %43 : vector<1x1x128xf32> to vector<1x128xf32>
    %45 = vector.broadcast %44 : vector<1x128xf32> to vector<16x128xf32>
    %46 = arith.addf %42, %45 : vector<16x128xf32>
    %47 = arith.addf %0, %46 : vector<16x128xf32>
    %c1 = arith.constant 1 : index
    %c0_32 = arith.constant 0 : index
    %c0_33 = arith.constant 0 : index
    %48 = vector.load %arg4[%c1, %c0_32, %c0_33] : memref<3x1x128xf32, #tpu.memory_space<vmem>>, vector<1x1x128xf32>
    %49 = vector.shape_cast %48 : vector<1x1x128xf32> to vector<1x128xf32>
    %c1_34 = arith.constant 1 : index
    %c0_35 = arith.constant 0 : index
    %c0_36 = arith.constant 0 : index
    %50 = vector.load %arg5[%c1_34, %c0_35, %c0_36] : memref<3x1x128xf32, #tpu.memory_space<vmem>>, vector<1x1x128xf32>
    %51 = vector.shape_cast %50 : vector<1x1x128xf32> to vector<1x128xf32>
    %52 = vector.broadcast %49 : vector<1x128xf32> to vector<16x128xf32>
    %53 = arith.mulf %52, %47 : vector<16x128xf32>
    %cst_37 = arith.constant 5.000000e-01 : f32
    %54 = vector.broadcast %cst_37 : f32 to vector<1x128xf32>
    %55 = arith.mulf %54, %51 : vector<1x128xf32>
    %56 = vector.broadcast %55 : vector<1x128xf32> to vector<16x128xf32>
    %57 = arith.mulf %56, %47 : vector<16x128xf32>
    %58 = math.tanh %57 : vector<16x128xf32>
    %cst_38 = arith.constant 5.000000e-01 : f32
    %59 = vector.broadcast %cst_38 : f32 to vector<16x128xf32>
    %60 = arith.mulf %59, %58 : vector<16x128xf32>
    %cst_39 = arith.constant 5.000000e-01 : f32
    %61 = vector.broadcast %cst_39 : f32 to vector<16x128xf32>
    %62 = arith.addf %60, %61 : vector<16x128xf32>
    %63 = arith.mulf %53, %62 : vector<16x128xf32>
    %c1_40 = arith.constant 1 : index
    %c0_41 = arith.constant 0 : index
    %c0_42 = arith.constant 0 : index
    %64 = vector.load %arg2[%c1_40, %c0_41, %c0_42] : memref<3x128x128xf32, #tpu.memory_space<vmem>>, vector<1x128x128xf32>
    %65 = vector.shape_cast %64 : vector<1x128x128xf32> to vector<128x128xf32>
    %cst_43 = arith.constant dense<0.000000e+00> : vector<16x128xf32>
    %66 = tpu.matmul %63, %65, %cst_43 {dimension_numbers = #tpu.dot_dimension_numbers<[1], [0], [0], [1], [0, 0, 1, 1], [], []>} : vector<16x128xf32>, vector<128x128xf32>, vector<16x128xf32> -> vector<16x128xf32>
    %c1_44 = arith.constant 1 : index
    %c0_45 = arith.constant 0 : index
    %c0_46 = arith.constant 0 : index
    %67 = vector.load %arg3[%c1_44, %c0_45, %c0_46] : memref<3x1x128xf32, #tpu.memory_space<vmem>>, vector<1x1x128xf32>
    %68 = vector.shape_cast %67 : vector<1x1x128xf32> to vector<1x128xf32>
    %69 = vector.broadcast %68 : vector<1x128xf32> to vector<16x128xf32>
    %70 = arith.addf %66, %69 : vector<16x128xf32>
    %c1_47 = arith.constant 1 : index
    %c0_48 = arith.constant 0 : index
    %c0_49 = arith.constant 0 : index
    %71 = vector.load %arg8[%c1_47, %c0_48, %c0_49] : memref<3x1x128xf32, #tpu.memory_space<vmem>>, vector<1x1x128xf32>
    %72 = vector.shape_cast %71 : vector<1x1x128xf32> to vector<1x128xf32>
    %c1_50 = arith.constant 1 : index
    %c0_51 = arith.constant 0 : index
    %c0_52 = arith.constant 0 : index
    %73 = vector.load %arg9[%c1_50, %c0_51, %c0_52] : memref<3x1x128xf32, #tpu.memory_space<vmem>>, vector<1x1x128xf32>
    %74 = vector.shape_cast %73 : vector<1x1x128xf32> to vector<1x128xf32>
    %75 = vector.broadcast %72 : vector<1x128xf32> to vector<16x128xf32>
    %76 = arith.mulf %75, %70 : vector<16x128xf32>
    %cst_53 = arith.constant 5.000000e-01 : f32
    %77 = vector.broadcast %cst_53 : f32 to vector<1x128xf32>
    %78 = arith.mulf %77, %74 : vector<1x128xf32>
    %79 = vector.broadcast %78 : vector<1x128xf32> to vector<16x128xf32>
    %80 = arith.mulf %79, %70 : vector<16x128xf32>
    %81 = math.tanh %80 : vector<16x128xf32>
    %cst_54 = arith.constant 5.000000e-01 : f32
    %82 = vector.broadcast %cst_54 : f32 to vector<16x128xf32>
    %83 = arith.mulf %82, %81 : vector<16x128xf32>
    %cst_55 = arith.constant 5.000000e-01 : f32
    %84 = vector.broadcast %cst_55 : f32 to vector<16x128xf32>
    %85 = arith.addf %83, %84 : vector<16x128xf32>
    %86 = arith.mulf %76, %85 : vector<16x128xf32>
    %c1_56 = arith.constant 1 : index
    %c0_57 = arith.constant 0 : index
    %c0_58 = arith.constant 0 : index
    %87 = vector.load %arg6[%c1_56, %c0_57, %c0_58] : memref<3x128x128xf32, #tpu.memory_space<vmem>>, vector<1x128x128xf32>
    %88 = vector.shape_cast %87 : vector<1x128x128xf32> to vector<128x128xf32>
    %cst_59 = arith.constant dense<0.000000e+00> : vector<16x128xf32>
    %89 = tpu.matmul %86, %88, %cst_59 {dimension_numbers = #tpu.dot_dimension_numbers<[1], [0], [0], [1], [0, 0, 1, 1], [], []>} : vector<16x128xf32>, vector<128x128xf32>, vector<16x128xf32> -> vector<16x128xf32>
    %c1_60 = arith.constant 1 : index
    %c0_61 = arith.constant 0 : index
    %c0_62 = arith.constant 0 : index
    %90 = vector.load %arg7[%c1_60, %c0_61, %c0_62] : memref<3x1x128xf32, #tpu.memory_space<vmem>>, vector<1x1x128xf32>
    %91 = vector.shape_cast %90 : vector<1x1x128xf32> to vector<1x128xf32>
    %92 = vector.broadcast %91 : vector<1x128xf32> to vector<16x128xf32>
    %93 = arith.addf %89, %92 : vector<16x128xf32>
    %94 = arith.addf %47, %93 : vector<16x128xf32>
    %c2 = arith.constant 2 : index
    %c0_63 = arith.constant 0 : index
    %c0_64 = arith.constant 0 : index
    %95 = vector.load %arg4[%c2, %c0_63, %c0_64] : memref<3x1x128xf32, #tpu.memory_space<vmem>>, vector<1x1x128xf32>
    %96 = vector.shape_cast %95 : vector<1x1x128xf32> to vector<1x128xf32>
    %c2_65 = arith.constant 2 : index
    %c0_66 = arith.constant 0 : index
    %c0_67 = arith.constant 0 : index
    %97 = vector.load %arg5[%c2_65, %c0_66, %c0_67] : memref<3x1x128xf32, #tpu.memory_space<vmem>>, vector<1x1x128xf32>
    %98 = vector.shape_cast %97 : vector<1x1x128xf32> to vector<1x128xf32>
    %99 = vector.broadcast %96 : vector<1x128xf32> to vector<16x128xf32>
    %100 = arith.mulf %99, %94 : vector<16x128xf32>
    %cst_68 = arith.constant 5.000000e-01 : f32
    %101 = vector.broadcast %cst_68 : f32 to vector<1x128xf32>
    %102 = arith.mulf %101, %98 : vector<1x128xf32>
    %103 = vector.broadcast %102 : vector<1x128xf32> to vector<16x128xf32>
    %104 = arith.mulf %103, %94 : vector<16x128xf32>
    %105 = math.tanh %104 : vector<16x128xf32>
    %cst_69 = arith.constant 5.000000e-01 : f32
    %106 = vector.broadcast %cst_69 : f32 to vector<16x128xf32>
    %107 = arith.mulf %106, %105 : vector<16x128xf32>
    %cst_70 = arith.constant 5.000000e-01 : f32
    %108 = vector.broadcast %cst_70 : f32 to vector<16x128xf32>
    %109 = arith.addf %107, %108 : vector<16x128xf32>
    %110 = arith.mulf %100, %109 : vector<16x128xf32>
    %c2_71 = arith.constant 2 : index
    %c0_72 = arith.constant 0 : index
    %c0_73 = arith.constant 0 : index
    %111 = vector.load %arg2[%c2_71, %c0_72, %c0_73] : memref<3x128x128xf32, #tpu.memory_space<vmem>>, vector<1x128x128xf32>
    %112 = vector.shape_cast %111 : vector<1x128x128xf32> to vector<128x128xf32>
    %cst_74 = arith.constant dense<0.000000e+00> : vector<16x128xf32>
    %113 = tpu.matmul %110, %112, %cst_74 {dimension_numbers = #tpu.dot_dimension_numbers<[1], [0], [0], [1], [0, 0, 1, 1], [], []>} : vector<16x128xf32>, vector<128x128xf32>, vector<16x128xf32> -> vector<16x128xf32>
    %c2_75 = arith.constant 2 : index
    %c0_76 = arith.constant 0 : index
    %c0_77 = arith.constant 0 : index
    %114 = vector.load %arg3[%c2_75, %c0_76, %c0_77] : memref<3x1x128xf32, #tpu.memory_space<vmem>>, vector<1x1x128xf32>
    %115 = vector.shape_cast %114 : vector<1x1x128xf32> to vector<1x128xf32>
    %116 = vector.broadcast %115 : vector<1x128xf32> to vector<16x128xf32>
    %117 = arith.addf %113, %116 : vector<16x128xf32>
    %c2_78 = arith.constant 2 : index
    %c0_79 = arith.constant 0 : index
    %c0_80 = arith.constant 0 : index
    %118 = vector.load %arg8[%c2_78, %c0_79, %c0_80] : memref<3x1x128xf32, #tpu.memory_space<vmem>>, vector<1x1x128xf32>
    %119 = vector.shape_cast %118 : vector<1x1x128xf32> to vector<1x128xf32>
    %c2_81 = arith.constant 2 : index
    %c0_82 = arith.constant 0 : index
    %c0_83 = arith.constant 0 : index
    %120 = vector.load %arg9[%c2_81, %c0_82, %c0_83] : memref<3x1x128xf32, #tpu.memory_space<vmem>>, vector<1x1x128xf32>
    %121 = vector.shape_cast %120 : vector<1x1x128xf32> to vector<1x128xf32>
    %122 = vector.broadcast %119 : vector<1x128xf32> to vector<16x128xf32>
    %123 = arith.mulf %122, %117 : vector<16x128xf32>
    %cst_84 = arith.constant 5.000000e-01 : f32
    %124 = vector.broadcast %cst_84 : f32 to vector<1x128xf32>
    %125 = arith.mulf %124, %121 : vector<1x128xf32>
    %126 = vector.broadcast %125 : vector<1x128xf32> to vector<16x128xf32>
    %127 = arith.mulf %126, %117 : vector<16x128xf32>
    %128 = math.tanh %127 : vector<16x128xf32>
    %cst_85 = arith.constant 5.000000e-01 : f32
    %129 = vector.broadcast %cst_85 : f32 to vector<16x128xf32>
    %130 = arith.mulf %129, %128 : vector<16x128xf32>
    %cst_86 = arith.constant 5.000000e-01 : f32
    %131 = vector.broadcast %cst_86 : f32 to vector<16x128xf32>
    %132 = arith.addf %130, %131 : vector<16x128xf32>
    %133 = arith.mulf %123, %132 : vector<16x128xf32>
    %c2_87 = arith.constant 2 : index
    %c0_88 = arith.constant 0 : index
    %c0_89 = arith.constant 0 : index
    %134 = vector.load %arg6[%c2_87, %c0_88, %c0_89] : memref<3x128x128xf32, #tpu.memory_space<vmem>>, vector<1x128x128xf32>
    %135 = vector.shape_cast %134 : vector<1x128x128xf32> to vector<128x128xf32>
    %cst_90 = arith.constant dense<0.000000e+00> : vector<16x128xf32>
    %136 = tpu.matmul %133, %135, %cst_90 {dimension_numbers = #tpu.dot_dimension_numbers<[1], [0], [0], [1], [0, 0, 1, 1], [], []>} : vector<16x128xf32>, vector<128x128xf32>, vector<16x128xf32> -> vector<16x128xf32>
    %c2_91 = arith.constant 2 : index
    %c0_92 = arith.constant 0 : index
    %c0_93 = arith.constant 0 : index
    %137 = vector.load %arg7[%c2_91, %c0_92, %c0_93] : memref<3x1x128xf32, #tpu.memory_space<vmem>>, vector<1x1x128xf32>
    %138 = vector.shape_cast %137 : vector<1x1x128xf32> to vector<1x128xf32>
    %139 = vector.broadcast %138 : vector<1x128xf32> to vector<16x128xf32>
    %140 = arith.addf %136, %139 : vector<16x128xf32>
    %141 = arith.addf %94, %140 : vector<16x128xf32>
    %c0_94 = arith.constant 0 : index
    %c0_95 = arith.constant 0 : index
    %142 = vector.load %arg10[%c0_94, %c0_95] : memref<1x128xf32, #tpu.memory_space<vmem>>, vector<1x128xf32>
    %c0_96 = arith.constant 0 : index
    %c0_97 = arith.constant 0 : index
    %143 = vector.load %arg11[%c0_96, %c0_97] : memref<1x128xf32, #tpu.memory_space<vmem>>, vector<1x128xf32>
    %144 = vector.broadcast %142 : vector<1x128xf32> to vector<16x128xf32>
    %145 = arith.mulf %144, %141 : vector<16x128xf32>
    %cst_98 = arith.constant 5.000000e-01 : f32
    %146 = vector.broadcast %cst_98 : f32 to vector<1x128xf32>
    %147 = arith.mulf %146, %143 : vector<1x128xf32>
    %148 = vector.broadcast %147 : vector<1x128xf32> to vector<16x128xf32>
    %149 = arith.mulf %148, %141 : vector<16x128xf32>
    %150 = math.tanh %149 : vector<16x128xf32>
    %cst_99 = arith.constant 5.000000e-01 : f32
    %151 = vector.broadcast %cst_99 : f32 to vector<16x128xf32>
    %152 = arith.mulf %151, %150 : vector<16x128xf32>
    %cst_100 = arith.constant 5.000000e-01 : f32
    %153 = vector.broadcast %cst_100 : f32 to vector<16x128xf32>
    %154 = arith.addf %152, %153 : vector<16x128xf32>
    %155 = arith.mulf %145, %154 : vector<16x128xf32>
    %c0_101 = arith.constant 0 : index
    %c0_102 = arith.constant 0 : index
    %156 = vector.load %arg12[%c0_101, %c0_102] : memref<128x128xf32, #tpu.memory_space<vmem>>, vector<128x128xf32>
    %cst_103 = arith.constant dense<0.000000e+00> : vector<16x128xf32>
    %157 = tpu.matmul %155, %156, %cst_103 {dimension_numbers = #tpu.dot_dimension_numbers<[1], [0], [0], [1], [0, 0, 1, 1], [], []>} : vector<16x128xf32>, vector<128x128xf32>, vector<16x128xf32> -> vector<16x128xf32>
    %c0_104 = arith.constant 0 : index
    %c0_105 = arith.constant 0 : index
    %158 = vector.load %arg13[%c0_104, %c0_105] : memref<1x128xf32, #tpu.memory_space<vmem>>, vector<1x128xf32>
    %159 = vector.broadcast %158 : vector<1x128xf32> to vector<16x128xf32>
    %160 = arith.addf %157, %159 : vector<16x128xf32>
    %c0_106 = arith.constant 0 : index
    %c0_107 = arith.constant 0 : index
    %161 = vector.load %arg14[%c0_106, %c0_107] : memref<16x128xf32, #tpu.memory_space<vmem>>, vector<16x128xf32>
    tpu.vector_store %arg14[%c0_106, %c0_107], %160 {strides = array<i32>} : memref<16x128xf32, #tpu.memory_space<vmem>>, vector<16x128xf32>,
    return
  }
  func.func @transform_0(%arg0: i32) -> (i32, i32) {
    %c0_i32 = arith.constant 0 : i32
    %c0_i32_0 = arith.constant 0 : i32
    return %arg0, %c0_i32 : i32, i32
  }
  func.func @transform_1(%arg0: i32) -> (i32, i32, i32) {
    %c0_i32 = arith.constant 0 : i32
    %c0_i32_0 = arith.constant 0 : i32
    %c0_i32_1 = arith.constant 0 : i32
    %c0_i32_2 = arith.constant 0 : i32
    return %c0_i32, %c0_i32_0, %c0_i32_1 : i32, i32, i32
  }
  func.func @transform_2(%arg0: i32) -> (i32, i32, i32) {
    %c0_i32 = arith.constant 0 : i32
    %c0_i32_0 = arith.constant 0 : i32
    %c0_i32_1 = arith.constant 0 : i32
    %c0_i32_2 = arith.constant 0 : i32
    return %c0_i32, %c0_i32_0, %c0_i32_1 : i32, i32, i32
  }
  func.func @transform_3(%arg0: i32) -> (i32, i32, i32) {
    %c0_i32 = arith.constant 0 : i32
    %c0_i32_0 = arith.constant 0 : i32
    %c0_i32_1 = arith.constant 0 : i32
    %c0_i32_2 = arith.constant 0 : i32
    return %c0_i32, %c0_i32_0, %c0_i32_1 : i32, i32, i32
  }
  func.func @transform_4(%arg0: i32) -> (i32, i32, i32) {
    %c0_i32 = arith.constant 0 : i32
    %c0_i32_0 = arith.constant 0 : i32
    %c0_i32_1 = arith.constant 0 : i32
    %c0_i32_2 = arith.constant 0 : i32
    return %c0_i32, %c0_i32_0, %c0_i32_1 : i32, i32, i32
  }
  func.func @transform_5(%arg0: i32) -> (i32, i32, i32) {
    %c0_i32 = arith.constant 0 : i32
    %c0_i32_0 = arith.constant 0 : i32
    %c0_i32_1 = arith.constant 0 : i32
    %c0_i32_2 = arith.constant 0 : i32
    return %c0_i32, %c0_i32_0, %c0_i32_1 : i32, i32, i32
  }
  func.func @transform_6(%arg0: i32) -> (i32, i32, i32) {
    %c0_i32 = arith.constant 0 : i32
    %c0_i32_0 = arith.constant 0 : i32
    %c0_i32_1 = arith.constant 0 : i32
    %c0_i32_2 = arith.constant 0 : i32
    return %c0_i32, %c0_i32_0, %c0_i32_1 : i32, i32, i32
  }
  func.func @transform_7(%arg0: i32) -> (i32, i32, i32) {
    %c0_i32 = arith.constant 0 : i32
    %c0_i32_0 = arith.constant 0 : i32
    %c0_i32_1 = arith.constant 0 : i32
    %c0_i32_2 = arith.constant 0 : i32
    return %c0_i32, %c0_i32_0, %c0_i32_1 : i32, i32, i32
  }
  func.func @transform_8(%arg0: i32) -> (i32, i32, i32) {
    %c0_i32 = arith.constant 0 : i32
    %c0_i32_0 = arith.constant 0 : i32
    %c0_i32_1 = arith.constant 0 : i32
    %c0_i32_2 = arith.constant 0 : i32
    return %c0_i32, %c0_i32_0, %c0_i32_1 : i32, i32, i32
  }
  func.func @transform_9(%arg0: i32) -> (i32, i32) {
    %c0_i32 = arith.constant 0 : i32
    %c0_i32_0 = arith.constant 0 : i32
    %c0_i32_1 = arith.constant 0 : i32
    return %c0_i32, %c0_i32_0 : i32, i32
  }
  func.func @transform_10(%arg0: i32) -> (i32, i32) {
    %c0_i32 = arith.constant 0 : i32
    %c0_i32_0 = arith.constant 0 : i32
    %c0_i32_1 = arith.constant 0 : i32
    return %c0_i32, %c0_i32_0 : i32, i32
  }
  func.func @transform_11(%arg0: i32) -> (i32, i32) {
    %c0_i32 = arith.constant 0 : i32
    %c0_i32_0 = arith.constant 0 : i32
    %c0_i32_1 = arith.constant 0 : i32
    return %c0_i32, %c0_i32_0 : i32, i32
  }
  func.func @transform_12(%arg0: i32) -> (i32, i32) {
    %c0_i32 = arith.constant 0 : i32
    %c0_i32_0 = arith.constant 0 : i32
    %c0_i32_1 = arith.constant 0 : i32
    return %c0_i32, %c0_i32_0 : i32, i32
  }
  func.func @transform_13(%arg0: i32) -> (i32, i32) {
    %c0_i32 = arith.constant 0 : i32
    %c0_i32_0 = arith.constant 0 : i32
    return %arg0, %c0_i32 : i32, i32
  }
}

</mosaic_0001>

<bundles_post_ra>
// kernel: _residual_mlp_padded.1
= control target key start
LH: loop header
LB: loop body
LE: loop exit
PB: predicated region body
PF: predicated region fallthrough
CT: control target
= control target key end

     0   :  { %18 = vsyncpa [#allocation3], 0  ;;  %s1730_s0 = inlined_call_operand.vmem [shape: f32[16,128], index: 0, kind: input, shape index: {}]   ;;  %s1731_s1 = inlined_call_operand.hbm [shape: f32[3,128,128], index: 1, kind: input, shape index: {}]   ;;  %s1732_s2 = inlined_call_operand.vmem [shape: f32[3,1,128], index: 2, kind: input, shape index: {}]   ;;  %s1733_s3 = inlined_call_operand.vmem [shape: f32[3,1,128], index: 3, kind: input, shape index: {}]   ;;  %s1734_s4 = inlined_call_operand.vmem [shape: f32[3,1,128], index: 4, kind: input, shape index: {}]   ;;  %s1735_s5 = inlined_call_operand.hbm [shape: f32[3,128,128], index: 5, kind: input, shape index: {}]   ;;  %s1736_s6 = inlined_call_operand.vmem [shape: f32[3,1,128], index: 6, kind: input, shape index: {}]   ;;  %s1737_s7 = inlined_call_operand.vmem [shape: f32[3,1,128], index: 7, kind: input, shape index: {}]   ;;  %s1738_s8 = inlined_call_operand.vmem [shape: f32[3,1,128], index: 8, kind: input, shape index: {}]   ;;  %s1739_s9 = inlined_call_operand.vmem [shape: f32[1,128], index: 9, kind: input, shape index: {}]   ;;  %s1740_s10 = inlined_call_operand.vmem [shape: f32[1,128], index: 10, kind: input, shape index: {}]   ;;  %s1741_s11 = inlined_call_operand.hbm [shape: f32[128,128], index: 11, kind: input, shape index: {}]   ;;  %s1742_s12 = inlined_call_operand.vmem [shape: f32[1,128], index: 12, kind: input, shape index: {}]   ;;  %s1743_s13 = inlined_call_operand.hbm [shape: f32[16,128], index: 13, kind: output, shape index: {}]  }
   0x1   :  { %19 = vsyncpa [#allocation6], 0 }
   0x2   :  { %20 = vsyncpa [#allocation4], 0  ;;  %s1522_s25 = smov [#allocation5]   ;;  %s1523_s27 = smov [#allocation2]  }
   0x3   :  { %s46_s26 = sshll.u32 %s1522_s25, 4  ;;  %s28_s28 = sshll.u32 %s1523_s27, 4  ;;  %s47_s26 = int_to_ptr.vmem [resolvable:$true] %s46_s26  ;;  %s29_s28 = int_to_ptr.vmem [resolvable:$true] %s28_s28 }
   0x4   :  { %s1444_s29 = scalar_lea.vmem %s47_s26, 6144  ;;  %p1449_p1 = scmp.lt.s32.totalorder %s47_s26, %s47_s26 }
   0x5   :  { %p1445_p0 = scmp.ne.s32.totalorder %s47_s26, %s1444_s29  ;;  %p1450_p2 = scmp.lt.s32.totalorder %s1444_s29, %s1444_s29 }
   0x7   :  { %p1451_p3 = por %p1450_p2, %p1449_p1 }
   0x9   :  { %p1452_p4 = pnand %p1451_p3, %p1445_p0 }
   0xb   :  { %1455 = shalt.err (!%p1452_p4)
}
   0xc   :  { %s1524_s30 = smov 128   ;;  %s1525_s14 = smov 8  }
   0xd   :  { %52 = dma.hbm_to_vmem [thread:$0]  %s1735_s5, 6144, %s47_s26, [#allocation6], %s1524_s30, %s1524_s30, %s1525_s14  }
   0xe   :  { %s1464_s17 = scalar_lea.vmem %s29_s28, 6144  ;;  %p1469_p6 = scmp.lt.s32.totalorder %s29_s28, %s29_s28 }
   0xf   :  { %p1465_p5 = scmp.ne.s32.totalorder %s29_s28, %s1464_s17  ;;  %p1470_p7 = scmp.lt.s32.totalorder %s1464_s17, %s1464_s17 }
  0x11   :  { %p1471_p8 = por %p1470_p7, %p1469_p6 }
  0x13   :  { %p1472_p9 = pnand %p1471_p8, %p1465_p5 }
  0x15   :  { %1475 = shalt.err (!%p1472_p9)
}
  0x16   :  { %34 = dma.hbm_to_vmem [thread:$0]  %s1731_s1, 6144, %s29_s28, [#allocation3], %s1524_s30, %s1524_s30, %s1525_s14  }
  0x17   :  { %s1526_s20 = smov [#allocation7]  }
  0x18   :  { %s68_s21 = sshll.u32 %s1526_s20, 4  ;;  %s69_s21 = int_to_ptr.vmem [resolvable:$true] %s68_s21 }
  0x19   :  { %s1484_s22 = scalar_lea.vmem %s69_s21, 2048  ;;  %p1489_p11 = scmp.lt.s32.totalorder %s69_s21, %s69_s21 }
  0x1a   :  { %p1485_p10 = scmp.ne.s32.totalorder %s69_s21, %s1484_s22  ;;  %p1490_p12 = scmp.lt.s32.totalorder %s1484_s22, %s1484_s22 }
  0x1c   :  { %p1491_p13 = por %p1490_p12, %p1489_p11 }
  0x1e   :  { %p1492_p0 = pnand %p1491_p13, %p1485_p10 }
  0x20   :  { %1495 = shalt.err (!%p1492_p0)
}
  0x21   :  { %74 = dma.hbm_to_vmem [thread:$0]  %s1741_s11, 2048, %s69_s21, [#allocation6], %s1524_s30, %s1524_s30, %s1525_s14  }
  0x22   :  { %1516 = dma.done.wait [#allocation3], 6144  }
  0x23   :  { %1517 = vsyncadd [#allocation3], 4294961152 }
  0x24   :  { %1518 = dma.done.wait [#allocation6], 8192  }
  0x25   :  { %1519 = vsyncadd [#allocation6], 4294959104  ;;  %v100_v0 = vlaneseq  ;;  %v130_v1 = vld [vmem:[#allocation2 + $0x78] sm:$0xff]  ;;  %v129_v2 = vld [vmem:[#allocation2 + $0x70] sm:$0xff]  ;;  %s1527_s11 = smov [#allocation8]  }
  0x26   :  { %1157 = vmatprep.subr.mxu0 %v130_v1  ;;  %v128_v4 = vld [vmem:[#allocation2 + $0x68] sm:$0xff]  ;;  %v127_v5 = vld [vmem:[#allocation2 + $0x60] sm:$0xff]  ;;  %v126_v7 = vld [vmem:[#allocation2 + $0x58] sm:$0xff]  ;;  %s992_s24 = sshll.u32 %s1527_s11, 4  ;;  %s993_s24 = int_to_ptr.vmem [resolvable:$true] %s992_s24 }
  0x27   :  { %v101_v3 = vshrl.u32 %v100_v0, 7  ;;  %1158 = vmatpush3.msra.mxu0 %v130_v1  ;;  %v89_v8 = vld [vmem:[%s1734_s4] sm:$0x1]  ;;  %v255_v9 = vld [vmem:[#allocation5 + $0x78] sm:$0xff]  ;;  %v254_v11 = vld [vmem:[#allocation5 + $0x70] sm:$0xff]  ;;  %p1501_p2 = scmp.lt.s32.totalorder %s993_s24, %s993_s24 }
  0x28   :  { %1159 = vmatprep.subr.mxu0 %v129_v2  ;;  %v98_v10 = vmul.f32 0.5, %v89_v8  ;;  %1192 = vmatprep.subr.mxu1 %v255_v9  ;;  %v125_v12 = vld [vmem:[#allocation2 + $0x50] sm:$0xff]  ;;  %v1624_v13 = vld [vmem:[%s1730_s0] sm:$0xff]  ;;  %v1629_v14 = vld [vmem:[%s1730_s0 + $0x8] sm:$0xff] }
  0x29   :  { %1160 = vmatpush3.msra.mxu0 %v129_v2  ;;  %v1616_v6 = vsub.s32 0, %v101_v3  ;;  %1193 = vmatpush3.msra.mxu1 %v255_v9  ;;  %v124_v16 = vld [vmem:[#allocation2 + $0x48] sm:$0xff]  ;;  %v123_v19 = vld [vmem:[#allocation2 + $0x40] sm:$0xff]  ;;  %v122_v20 = vld [vmem:[#allocation2 + $0x38] sm:$0xff] }
  0x2a   :  { %1161 = vmatprep.subr.mxu0 %v128_v4  ;;  %1194 = vmatprep.subr.mxu1 %v254_v11  ;;  %v121_v21 = vld [vmem:[#allocation2 + $0x30] sm:$0xff]  ;;  %v120_v22 = vld [vmem:[#allocation2 + $0x28] sm:$0xff]  ;;  %v119_v23 = vld [vmem:[#allocation2 + $0x20] sm:$0xff] }
  0x2b   :  { %1162 = vmatpush3.msra.mxu0 %v128_v4  ;;  %v103_v15 = vrot.slane %v98_v10, %v1616_v6  ;;  %1195 = vmatpush3.msra.mxu1 %v254_v11  ;;  %v118_v24 = vld [vmem:[#allocation2 + $0x18] sm:$0xff]  ;;  %v117_v25 = vld [vmem:[#allocation2 + $0x10] sm:$0xff]  ;;  %v1005_v26 = vld [vmem:[%s1733_s3] ss:$0 sm:$0xff] }
  0x2c   :  { %1163 = vmatprep.subr.mxu0 %v127_v5  ;;  %v116_v28 = vld [vmem:[#allocation2 + $0x8] sm:$0xff]  ;;  %v96_v30 = vmul.f32 %v1005_v26, %v1624_v13  ;;  %v115_v32 = vld [vmem:[#allocation2] sm:$0xff]  ;;  %v97_v33 = vmul.f32 %v1005_v26, %v1629_v14  ;;  %v251_v41 = vld [vmem:[#allocation5 + $0x58] sm:$0xff] }
  0x2d   :  { %1164 = vmatpush3.msra.mxu0 %v127_v5  ;;  %v105_v17 = vmul.f32 %v103_v15, %v1624_v13  ;;  %v106_v18 = vmul.f32 %v103_v15, %v1629_v14  ;;  %v253_v39 = vld [vmem:[#allocation5 + $0x68] sm:$0xff]  ;;  %v252_v40 = vld [vmem:[#allocation5 + $0x60] sm:$0xff]  ;;  %v250_v42 = vld [vmem:[#allocation5 + $0x50] sm:$0xff] }
  0x2e   :  { %1165 = vmatprep.subr.mxu0 %v126_v7  ;;  %1196 = vmatprep.subr.mxu1 %v253_v39  ;;  %v249_v43 = vld [vmem:[#allocation5 + $0x48] sm:$0xff]  ;;  %v248_v44 = vld [vmem:[#allocation5 + $0x40] sm:$0xff]  ;;  %v247_v45 = vld [vmem:[#allocation5 + $0x38] sm:$0xff] }
  0x2f   :  { %1166 = vmatpush3.msra.mxu0 %v126_v7  ;;  %1408 = vtanh.f32 %v105_v17  ;;  %1197 = vmatpush3.msra.mxu1 %v253_v39  ;;  %v246_v46 = vld [vmem:[#allocation5 + $0x30] sm:$0xff]  ;;  %v245_v47 = vld [vmem:[#allocation5 + $0x28] sm:$0xff]  ;;  %v244_v48 = vld [vmem:[#allocation5 + $0x20] sm:$0xff] }
  0x30   :  { %1167 = vmatprep.subr.mxu0 %v125_v12  ;;  %1410 = vtanh.f32 %v106_v18  ;;  %1198 = vmatprep.subr.mxu1 %v252_v40  ;;  %v243_v49 = vld [vmem:[#allocation5 + $0x18] sm:$0xff]  ;;  %v242_v50 = vld [vmem:[#allocation5 + $0x10] sm:$0xff]  ;;  %v241_v51 = vld [vmem:[#allocation5 + $0x8] sm:$0xff] }
  0x31   :  { %1168 = vmatpush3.msra.mxu0 %v125_v12  ;;  %1199 = vmatpush3.msra.mxu1 %v252_v40  ;;  %v240_v52 = vld [vmem:[#allocation5] sm:$0xff]  ;;  %v385_v53 = vld [vmem:[#allocation2 + $0xf8] sm:$0xff]  ;;  %v384_v12 = vld [vmem:[#allocation2 + $0xf0] sm:$0xff] }
  0x32   :  { %1169 = vmatprep.subr.mxu0 %v124_v16  ;;  %1200 = vmatprep.subr.mxu1 %v251_v41  ;;  %v214_v54 = vld [vmem:[%s1738_s8] sm:$0x1]  ;;  %v383_v15 = vld [vmem:[#allocation2 + $0xe8] sm:$0xff]  ;;  %v381_v17 = vld [vmem:[#allocation2 + $0xd8] sm:$0xff] }
  0x33   :  { %1170 = vmatpush3.msra.mxu0 %v124_v16  ;;  %1201 = vmatpush3.msra.mxu1 %v251_v41  ;;  %v223_v55 = vmul.f32 0.5, %v214_v54  ;;  %v1006_v56 = vld [vmem:[%s1732_s2] ss:$0 sm:$0xff]  ;;  %v380_v18 = vld [vmem:[#allocation2 + $0xd0] sm:$0xff]  ;;  %v510_v54 = vld [vmem:[#allocation5 + $0xd8] sm:$0xff] }
  0x34   :  { %1171 = vmatprep.subr.mxu0 %v123_v19  ;;  %1202 = vmatprep.subr.mxu1 %v250_v42  ;;  %v1007_v3 = vld [vmem:[%s1737_s7] ss:$0 sm:$0xff]  ;;  %v372_v26 = vld [vmem:[#allocation2 + $0x90] sm:$0xff] }
  0x35   :  { %1172 = vmatpush3.msra.mxu0 %v123_v19  ;;  %1203 = vmatpush3.msra.mxu1 %v250_v42  ;;  %v228_v57 = vrot.slane %v223_v55, %v1616_v6  ;;  %v382_v16 = vld [vmem:[#allocation2 + $0xe0] sm:$0xff]  ;;  %v379_v19 = vld [vmem:[#allocation2 + $0xc8] sm:$0xff]  ;;  %v509_v55 = vld [vmem:[#allocation5 + $0xd0] sm:$0xff] }
  0x36   :  { %1173 = vmatprep.subr.mxu0 %v122_v20  ;;  %1204 = vmatprep.subr.mxu1 %v249_v43 }
  0x37   :  { %1174 = vmatpush3.msra.mxu0 %v122_v20  ;;  %1205 = vmatpush3.msra.mxu1 %v249_v43  ;;  %v378_v20 = vld [vmem:[#allocation2 + $0xc0] sm:$0xff] }
  0x38   :  { %1175 = vmatprep.subr.mxu0 %v121_v21  ;;  %1206 = vmatprep.subr.mxu1 %v248_v44 }
  0x39   :  { %1176 = vmatpush3.msra.mxu0 %v121_v21  ;;  %1207 = vmatpush3.msra.mxu1 %v248_v44  ;;  %v377_v21 = vld [vmem:[#allocation2 + $0xb8] sm:$0xff] }
  0x3a   :  { %1177 = vmatprep.subr.mxu0 %v120_v22  ;;  %1208 = vmatprep.subr.mxu1 %v247_v45 }
  0x3b   :  { %1178 = vmatpush3.msra.mxu0 %v120_v22  ;;  %1209 = vmatpush3.msra.mxu1 %v247_v45  ;;  %v376_v22 = vld [vmem:[#allocation2 + $0xb0] sm:$0xff] }
  0x3c   :  { %1179 = vmatprep.subr.mxu0 %v119_v23  ;;  %v1409_v27 = vpop.eup %1408  ;;  %1210 = vmatprep.subr.mxu1 %v246_v46 }
  0x3d   :  { %1180 = vmatpush3.msra.mxu0 %v119_v23  ;;  %v1411_v29 = vpop.eup %1410  ;;  %v109_v31 = vmul.f32 0.5, %v1409_v27  ;;  %1211 = vmatpush3.msra.mxu1 %v246_v46  ;;  %v375_v23 = vld [vmem:[#allocation2 + $0xa8] sm:$0xff]  ;;  %v1011_v46 = vld [vmem:[%s1733_s3 + $0x1] ss:$0 sm:$0xff] }
  0x3e   :  { %1181 = vmatprep.subr.mxu0 %v118_v24  ;;  %v110_v34 = vmul.f32 0.5, %v1411_v29  ;;  %1212 = vmatprep.subr.mxu1 %v245_v47  ;;  %v371_v27 = vld [vmem:[#allocation2 + $0x88] sm:$0xff]  ;;  %v514_v29 = vld [vmem:[#allocation5 + $0xf8] sm:$0xff] }
  0x3f   :  { %1182 = vmatpush3.msra.mxu0 %v118_v24  ;;  %v111_v35 = vadd.f32 0.5, %v109_v31  ;;  %1213 = vmatpush3.msra.mxu1 %v245_v47  ;;  %v374_v24 = vld [vmem:[#allocation2 + $0xa0] sm:$0xff] }
  0x40   :  { %1183 = vmatprep.subr.mxu0 %v117_v25  ;;  %v112_v36 = vadd.f32 0.5, %v110_v34  ;;  %1214 = vmatprep.subr.mxu1 %v244_v48  ;;  %v1010_v31 = vld [vmem:[%s1734_s4 + $0x1] sm:$0x1] }
  0x41   :  { %1184 = vmatpush3.msra.mxu0 %v117_v25  ;;  %v113_v37 = vmul.f32 %v111_v35, %v96_v30  ;;  %1215 = vmatpush3.msra.mxu1 %v244_v48  ;;  %v373_v25 = vld [vmem:[#allocation2 + $0x98] sm:$0xff]  ;;  %v513_v30 = vld [vmem:[#allocation5 + $0xf0] sm:$0xff] }
  0x42   :  { %1185 = vmatprep.subr.mxu0 %v116_v28  ;;  %v114_v38 = vmul.f32 %v112_v36, %v97_v33  ;;  %1216 = vmatprep.subr.mxu1 %v243_v49  ;;  %v1008_v33 = vld [vmem:[%s1736_s6] ss:$0 sm:$0xff] }
  0x43   :  { %1186 = vmatpush3.msra.mxu0 %v116_v28  ;;  %1189 = vmatprep.mubr.f32.mxu0 %v113_v37  ;;  %v370_v28 = vld [vmem:[#allocation2 + $0x80] sm:$0xff] }
  0x44   :  { %1187 = vmatprep.subr.mxu0 %v115_v32  ;;  %1217 = vmatpush3.msra.mxu1 %v243_v49 }
  0x45   :  { %1188 = vmatpush3.msra.mxu0 %v115_v32  ;;  %1218 = vmatprep.subr.mxu1 %v242_v50  ;;  %v352_v32 = vmul.f32 0.5, %v1010_v31  ;;  %v640_v31 = vld [vmem:[#allocation2 + $0x150] sm:$0xff] }
  0x46   :  { %1190 = vmatmul.mubr.f32.vlgmr.msra.gmra.mxu0 %v114_v38  ;;  %1219 = vmatpush3.msra.mxu1 %v242_v50 }
  0x47   :  { %1220 = vmatprep.subr.mxu1 %v241_v51  ;;  %1227 = vmatprep.subr.mxu0 %v385_v53  ;;  %v357_v36 = vrot.slane %v352_v32, %v1616_v6  ;;  %v639_v32 = vld [vmem:[#allocation2 + $0x148] sm:$0xff] }
  0x48   :  { %1221 = vmatpush3.msra.mxu1 %v241_v51  ;;  %1228 = vmatpush3.msra.mxu0 %v385_v53  ;;  %v511_v53 = vld [vmem:[#allocation5 + $0xe0] sm:$0xff] }
  0x49   :  { %1222 = vmatprep.subr.mxu1 %v240_v52  ;;  %1229 = vmatprep.subr.mxu0 %v384_v12 }
  0x4a   :  { %1223 = vmatpush3.msra.mxu1 %v240_v52  ;;  %1230 = vmatpush3.msra.mxu0 %v384_v12  ;;  %v512_v52 = vld [vmem:[#allocation5 + $0xe8] sm:$0xff] }
  0x4b   :  { %1231 = vmatprep.subr.mxu0 %v383_v15  ;;  %1262 = vmatprep.subr.mxu1 %v514_v29 }
  0x4c   :  { %1232 = vmatpush3.msra.mxu0 %v383_v15 }
  0x4d   :  { %1233 = vmatprep.subr.mxu0 %v382_v16 }
  0x4e   :  { %1234 = vmatpush3.msra.mxu0 %v382_v16 }
  0x4f   :  { %1235 = vmatprep.subr.mxu0 %v381_v17 }
  0x50   :  { %1236 = vmatpush3.msra.mxu0 %v381_v17 }
  0x51   :  { %1237 = vmatprep.subr.mxu0 %v380_v18 }
  0x52   :  { %1238 = vmatpush3.msra.mxu0 %v380_v18 }
  0x53   :  { %1239 = vmatprep.subr.mxu0 %v379_v19 }
  0x54   :  { %1240 = vmatpush3.msra.mxu0 %v379_v19  ;;  %v1016_v19 = vld [vmem:[%s1737_s7 + $0x1] ss:$0 sm:$0xff] }
  0x55   :  { %1241 = vmatprep.subr.mxu0 %v378_v20 }
  0x56   :  { %1242 = vmatpush3.msra.mxu0 %v378_v20 }
  0x57   :  { %1243 = vmatprep.subr.mxu0 %v377_v21 }
  0x58   :  { %1244 = vmatpush3.msra.mxu0 %v377_v21 }
  0x59   :  { %1245 = vmatprep.subr.mxu0 %v376_v22 }
  0x5a   :  { %1246 = vmatpush3.msra.mxu0 %v376_v22 }
  0x5b   :  { %1247 = vmatprep.subr.mxu0 %v375_v23 }
  0x5c   :  { %1248 = vmatpush3.msra.mxu0 %v375_v23 }
  0x5d   :  { %1249 = vmatprep.subr.mxu0 %v374_v24 }
  0x5e   :  { %1250 = vmatpush3.msra.mxu0 %v374_v24 }
  0x5f   :  { %1251 = vmatprep.subr.mxu0 %v373_v25 }
  0x60   :  { %1252 = vmatpush3.msra.mxu0 %v373_v25 }
  0x61   :  { %1253 = vmatprep.subr.mxu0 %v372_v26 }
  0x62   :  { %1254 = vmatpush3.msra.mxu0 %v372_v26 }
  0x63   :  { %1255 = vmatprep.subr.mxu0 %v371_v27 }
  0x64   :  { %1256 = vmatpush3.msra.mxu0 %v371_v27  ;;  %v644_v27 = vld [vmem:[#allocation2 + $0x170] sm:$0xff] }
  0x65   :  { %1257 = vmatprep.subr.mxu0 %v370_v28 }
  0x66   :  { %1258 = vmatpush3.msra.mxu0 %v370_v28  ;;  %v643_v28 = vld [vmem:[#allocation2 + $0x168] sm:$0xff] }
 0x106   :  { %v1191_v58 = vpop.f32.mrf.mxu0 }
 0x107   :  { %v210_v59 = vadd.f32 %v1191_v58, %v1006_v56  ;;  %v506_v58 = vld [vmem:[#allocation5 + $0xb8] sm:$0xff] }
 0x108   :  { %v204_v60 = vpop.f32.mrf.mxu0 }
 0x109   :  { %v231_v61 = vmul.f32 %v228_v57, %v210_v59  ;;  %v205_v62 = vadd.f32 %v1006_v56, %v204_v60  ;;  %v222_v9 = vmul.f32 %v1007_v3, %v210_v59  ;;  %v508_v56 = vld [vmem:[#allocation5 + $0xc8] sm:$0xff]  ;;  %v505_v59 = vld [vmem:[#allocation5 + $0xb0] sm:$0xff] }
 0x10a   :  { %v504_v60 = vld [vmem:[#allocation5 + $0xa8] sm:$0xff] }
 0x10b   :  { %1412 = vtanh.f32 %v231_v61  ;;  %v230_v63 = vmul.f32 %v228_v57, %v205_v62  ;;  %v221_v7 = vmul.f32 %v1007_v3, %v205_v62  ;;  %v507_v57 = vld [vmem:[#allocation5 + $0xc0] sm:$0xff]  ;;  %v502_v62 = vld [vmem:[#allocation5 + $0x98] sm:$0xff] }
 0x10c   :  { %v503_v61 = vld [vmem:[#allocation5 + $0xa0] sm:$0xff] }
 0x10d   :  { %1414 = vtanh.f32 %v230_v63  ;;  %v501_v63 = vld [vmem:[#allocation5 + $0x90] sm:$0xff]  ;;  %v1015_v3 = vld [vmem:[%s1738_s8 + $0x1] sm:$0x1] }
 0x118   :  { %v1413_v0 = vpop.eup %1412 }
 0x119   :  { %v235_v1 = vmul.f32 0.5, %v1413_v0  ;;  %v500_v0 = vld [vmem:[#allocation5 + $0x88] sm:$0xff] }
 0x11a   :  { %v1415_v2 = vpop.eup %1414 }
 0x11b   :  { %v234_v4 = vmul.f32 0.5, %v1415_v2  ;;  %v237_v5 = vadd.f32 0.5, %v235_v1  ;;  %v499_v1 = vld [vmem:[#allocation5 + $0x80] sm:$0xff]  ;;  %v645_v2 = vld [vmem:[#allocation2 + $0x178] sm:$0xff] }
 0x11c   :  { %1297 = vmatprep.subr.mxu0 %v645_v2 }
 0x11d   :  { %v236_v8 = vadd.f32 0.5, %v234_v4  ;;  %v239_v11 = vmul.f32 %v237_v5, %v222_v9  ;;  %v481_v4 = vmul.f32 0.5, %v1015_v3  ;;  %v1013_v5 = vld [vmem:[%s1732_s2 + $0x1] ss:$0 sm:$0xff]  ;;  %v770_v3 = vld [vmem:[#allocation5 + $0x158] sm:$0xff] }
 0x11f   :  { %v238_v10 = vmul.f32 %v236_v8, %v221_v7  ;;  %v486_v7 = vrot.slane %v481_v4, %v1616_v6  ;;  %v769_v4 = vld [vmem:[#allocation5 + $0x150] sm:$0xff] }
 0x121   :  { %1224 = vmatprep.mubr.f32.mxu1 %v238_v10 }
 0x122   :  { %1225 = vmatmul.mubr.f32.vlgmr.msra.gmra.mxu1 %v239_v11 }
 0x123   :  { %1263 = vmatpush3.msra.mxu1 %v514_v29  ;;  %v642_v29 = vld [vmem:[#allocation2 + $0x160] sm:$0xff] }
 0x124   :  { %1264 = vmatprep.subr.mxu1 %v513_v30 }
 0x125   :  { %1265 = vmatpush3.msra.mxu1 %v513_v30  ;;  %v641_v30 = vld [vmem:[#allocation2 + $0x158] sm:$0xff] }
 0x126   :  { %1266 = vmatprep.subr.mxu1 %v512_v52 }
 0x127   :  { %1267 = vmatpush3.msra.mxu1 %v512_v52 }
 0x128   :  { %1268 = vmatprep.subr.mxu1 %v511_v53 }
 0x129   :  { %1269 = vmatpush3.msra.mxu1 %v511_v53 }
 0x12a   :  { %1270 = vmatprep.subr.mxu1 %v510_v54 }
 0x12b   :  { %1271 = vmatpush3.msra.mxu1 %v510_v54 }
 0x12c   :  { %1272 = vmatprep.subr.mxu1 %v509_v55 }
 0x12d   :  { %1273 = vmatpush3.msra.mxu1 %v509_v55 }
 0x12e   :  { %1274 = vmatprep.subr.mxu1 %v508_v56 }
 0x12f   :  { %1275 = vmatpush3.msra.mxu1 %v508_v56 }
 0x130   :  { %1276 = vmatprep.subr.mxu1 %v507_v57 }
 0x131   :  { %1277 = vmatpush3.msra.mxu1 %v507_v57 }
 0x132   :  { %1278 = vmatprep.subr.mxu1 %v506_v58 }
 0x133   :  { %1279 = vmatpush3.msra.mxu1 %v506_v58 }
 0x134   :  { %1280 = vmatprep.subr.mxu1 %v505_v59 }
 0x135   :  { %1281 = vmatpush3.msra.mxu1 %v505_v59  ;;  %v1021_v59 = vld [vmem:[%s1733_s3 + $0x2] ss:$0 sm:$0xff] }
 0x136   :  { %1282 = vmatprep.subr.mxu1 %v504_v60 }
 0x137   :  { %1283 = vmatpush3.msra.mxu1 %v504_v60 }
 0x138   :  { %1284 = vmatprep.subr.mxu1 %v503_v61 }
 0x139   :  { %1285 = vmatpush3.msra.mxu1 %v503_v61 }
 0x13a   :  { %1286 = vmatprep.subr.mxu1 %v502_v62 }
 0x13b   :  { %1287 = vmatpush3.msra.mxu1 %v502_v62 }
 0x13c   :  { %1288 = vmatprep.subr.mxu1 %v501_v63 }
 0x13d   :  { %1289 = vmatpush3.msra.mxu1 %v501_v63 }
 0x13e   :  { %1290 = vmatprep.subr.mxu1 %v500_v0 }
 0x13f   :  { %1291 = vmatpush3.msra.mxu1 %v500_v0 }
 0x140   :  { %1292 = vmatprep.subr.mxu1 %v499_v1 }
 0x141   :  { %1293 = vmatpush3.msra.mxu1 %v499_v1  ;;  %v772_v1 = vld [vmem:[#allocation5 + $0x168] sm:$0xff] }
 0x1e2   :  { %v1226_v34 = vpop.f32.mrf.mxu1 }
 0x1e3   :  { %v335_v35 = vadd.f32 %v1226_v34, %v1008_v33  ;;  %v637_v34 = vld [vmem:[#allocation2 + $0x138] sm:$0xff] }
 0x1e4   :  { %v329_v37 = vpop.f32.mrf.mxu1 }
 0x1e5   :  { %v1657_v38 = vadd.f32 %v335_v35, %v1629_v14  ;;  %v330_v39 = vadd.f32 %v1008_v33, %v329_v37  ;;  %v638_v33 = vld [vmem:[#allocation2 + $0x140] sm:$0xff]  ;;  %v636_v35 = vld [vmem:[#allocation2 + $0x130] sm:$0xff] }
 0x1e6   :  { %v634_v37 = vld [vmem:[#allocation2 + $0x120] sm:$0xff] }
 0x1e7   :  { %v360_v40 = vmul.f32 %v357_v36, %v1657_v38  ;;  %v1661_v41 = vadd.f32 %v330_v39, %v1624_v13  ;;  %v351_v50 = vmul.f32 %v1011_v46, %v1657_v38  ;;  %v633_v39 = vld [vmem:[#allocation2 + $0x118] sm:$0xff] }
 0x1e9   :  { %1416 = vtanh.f32 %v360_v40  ;;  %v359_v42 = vmul.f32 %v357_v36, %v1661_v41  ;;  %v350_v48 = vmul.f32 %v1011_v46, %v1661_v41  ;;  %v635_v36 = vld [vmem:[#allocation2 + $0x128] sm:$0xff]  ;;  %v632_v40 = vld [vmem:[#allocation2 + $0x110] sm:$0xff]  ;;  %v1020_v46 = vld [vmem:[%s1734_s4 + $0x2] sm:$0x1] }
 0x1eb   :  { %1418 = vtanh.f32 %v359_v42  ;;  %v631_v42 = vld [vmem:[#allocation2 + $0x108] sm:$0xff] }
 0x1f6   :  { %v1417_v43 = vpop.eup %1416 }
 0x1f7   :  { %v364_v44 = vmul.f32 0.5, %v1417_v43  ;;  %v630_v43 = vld [vmem:[#allocation2 + $0x100] sm:$0xff] }
 0x1f8   :  { %v1419_v45 = vpop.eup %1418 }
 0x1f9   :  { %v363_v47 = vmul.f32 0.5, %v1419_v45  ;;  %v366_v14 = vadd.f32 0.5, %v364_v44  ;;  %v774_v44 = vld [vmem:[#allocation5 + $0x178] sm:$0xff]  ;;  %v773_v45 = vld [vmem:[#allocation5 + $0x170] sm:$0xff] }
 0x1fa   :  { %1332 = vmatprep.subr.mxu1 %v774_v44 }
 0x1fb   :  { %v365_v49 = vadd.f32 0.5, %v363_v47  ;;  %v368_v51 = vmul.f32 %v366_v14, %v351_v50  ;;  %v612_v47 = vmul.f32 0.5, %v1020_v46  ;;  %v1018_v14 = vld [vmem:[%s1736_s6 + $0x1] ss:$0 sm:$0xff]  ;;  %v897_v46 = vld [vmem:[#allocation7 + $0x50] sm:$0xff] }
 0x1fd   :  { %v367_v13 = vmul.f32 %v365_v49, %v350_v48  ;;  %v617_v50 = vrot.slane %v612_v47, %v1616_v6  ;;  %v896_v47 = vld [vmem:[#allocation7 + $0x48] sm:$0xff] }
 0x1ff   :  { %1259 = vmatprep.mubr.f32.mxu0 %v367_v13 }
 0x200   :  { %1260 = vmatmul.mubr.f32.vlgmr.msra.gmra.mxu0 %v368_v51 }
 0x201   :  { %1298 = vmatpush3.msra.mxu0 %v645_v2  ;;  %v771_v2 = vld [vmem:[#allocation5 + $0x160] sm:$0xff] }
 0x202   :  { %1299 = vmatprep.subr.mxu0 %v644_v27 }
 0x203   :  { %1300 = vmatpush3.msra.mxu0 %v644_v27 }
 0x204   :  { %1301 = vmatprep.subr.mxu0 %v643_v28 }
 0x205   :  { %1302 = vmatpush3.msra.mxu0 %v643_v28 }
 0x206   :  { %1303 = vmatprep.subr.mxu0 %v642_v29 }
 0x207   :  { %1304 = vmatpush3.msra.mxu0 %v642_v29 }
 0x208   :  { %1305 = vmatprep.subr.mxu0 %v641_v30 }
 0x209   :  { %1306 = vmatpush3.msra.mxu0 %v641_v30 }
 0x20a   :  { %1307 = vmatprep.subr.mxu0 %v640_v31 }
 0x20b   :  { %1308 = vmatpush3.msra.mxu0 %v640_v31 }
 0x20c   :  { %1309 = vmatprep.subr.mxu0 %v639_v32 }
 0x20d   :  { %1310 = vmatpush3.msra.mxu0 %v639_v32  ;;  %v1026_v32 = vld [vmem:[%s1737_s7 + $0x2] ss:$0 sm:$0xff] }
 0x20e   :  { %1311 = vmatprep.subr.mxu0 %v638_v33 }
 0x20f   :  { %1312 = vmatpush3.msra.mxu0 %v638_v33 }
 0x210   :  { %1313 = vmatprep.subr.mxu0 %v637_v34 }
 0x211   :  { %1314 = vmatpush3.msra.mxu0 %v637_v34 }
 0x212   :  { %1315 = vmatprep.subr.mxu0 %v636_v35 }
 0x213   :  { %1316 = vmatpush3.msra.mxu0 %v636_v35 }
 0x214   :  { %1317 = vmatprep.subr.mxu0 %v635_v36 }
 0x215   :  { %1318 = vmatpush3.msra.mxu0 %v635_v36 }
 0x216   :  { %1319 = vmatprep.subr.mxu0 %v634_v37 }
 0x217   :  { %1320 = vmatpush3.msra.mxu0 %v634_v37 }
 0x218   :  { %1321 = vmatprep.subr.mxu0 %v633_v39 }
 0x219   :  { %1322 = vmatpush3.msra.mxu0 %v633_v39 }
 0x21a   :  { %1323 = vmatprep.subr.mxu0 %v632_v40 }
 0x21b   :  { %1324 = vmatpush3.msra.mxu0 %v632_v40 }
 0x21c   :  { %1325 = vmatprep.subr.mxu0 %v631_v42 }
 0x21d   :  { %1326 = vmatpush3.msra.mxu0 %v631_v42  ;;  %v901_v42 = vld [vmem:[#allocation7 + $0x70] sm:$0xff] }
 0x21e   :  { %1327 = vmatprep.subr.mxu0 %v630_v43 }
 0x21f   :  { %1328 = vmatpush3.msra.mxu0 %v630_v43  ;;  %v900_v43 = vld [vmem:[#allocation7 + $0x68] sm:$0xff] }
 0x2c0   :  { %v1261_v8 = vpop.f32.mrf.mxu0 }
 0x2c1   :  { %v466_v9 = vadd.f32 %v1261_v8, %v1013_v5  ;;  %v766_v8 = vld [vmem:[#allocation5 + $0x138] sm:$0xff] }
 0x2c2   :  { %v460_v10 = vpop.f32.mrf.mxu0 }
 0x2c3   :  { %v489_v11 = vmul.f32 %v486_v7, %v466_v9  ;;  %v461_v12 = vadd.f32 %v1013_v5, %v460_v10  ;;  %v480_v24 = vmul.f32 %v1016_v19, %v466_v9  ;;  %v768_v5 = vld [vmem:[#allocation5 + $0x148] sm:$0xff]  ;;  %v765_v9 = vld [vmem:[#allocation5 + $0x130] sm:$0xff] }
 0x2c4   :  { %v764_v10 = vld [vmem:[#allocation5 + $0x128] sm:$0xff] }
 0x2c5   :  { %1420 = vtanh.f32 %v489_v11  ;;  %v488_v15 = vmul.f32 %v486_v7, %v461_v12  ;;  %v479_v22 = vmul.f32 %v1016_v19, %v461_v12  ;;  %v767_v7 = vld [vmem:[#allocation5 + $0x140] sm:$0xff]  ;;  %v762_v12 = vld [vmem:[#allocation5 + $0x118] sm:$0xff] }
 0x2c6   :  { %v763_v11 = vld [vmem:[#allocation5 + $0x120] sm:$0xff] }
 0x2c7   :  { %1422 = vtanh.f32 %v488_v15  ;;  %v761_v15 = vld [vmem:[#allocation5 + $0x110] sm:$0xff]  ;;  %v1025_v19 = vld [vmem:[%s1738_s8 + $0x2] sm:$0x1] }
 0x2d2   :  { %v1421_v16 = vpop.eup %1420 }
 0x2d3   :  { %v493_v17 = vmul.f32 0.5, %v1421_v16  ;;  %v760_v16 = vld [vmem:[#allocation5 + $0x108] sm:$0xff] }
 0x2d4   :  { %v1423_v18 = vpop.eup %1422 }
 0x2d5   :  { %v492_v20 = vmul.f32 0.5, %v1423_v18  ;;  %v495_v21 = vadd.f32 0.5, %v493_v17  ;;  %v759_v17 = vld [vmem:[#allocation5 + $0x100] sm:$0xff]  ;;  %v902_v18 = vld [vmem:[#allocation7 + $0x78] sm:$0xff] }
 0x2d6   :  { %1367 = vmatprep.subr.mxu0 %v902_v18 }
 0x2d7   :  { %v494_v23 = vadd.f32 0.5, %v492_v20  ;;  %v497_v26 = vmul.f32 %v495_v21, %v480_v24  ;;  %v741_v20 = vmul.f32 0.5, %v1025_v19  ;;  %v1023_v21 = vld [vmem:[%s1732_s2 + $0x2] ss:$0 sm:$0xff] }
 0x2d9   :  { %v496_v25 = vmul.f32 %v494_v23, %v479_v22  ;;  %v746_v22 = vrot.slane %v741_v20, %v1616_v6 }
 0x2db   :  { %1294 = vmatprep.mubr.f32.mxu1 %v496_v25 }
 0x2dc   :  { %1295 = vmatmul.mubr.f32.vlgmr.msra.gmra.mxu1 %v497_v26 }
 0x2dd   :  { %1333 = vmatpush3.msra.mxu1 %v774_v44  ;;  %v899_v44 = vld [vmem:[#allocation7 + $0x60] sm:$0xff] }
 0x2de   :  { %1334 = vmatprep.subr.mxu1 %v773_v45 }
 0x2df   :  { %1335 = vmatpush3.msra.mxu1 %v773_v45  ;;  %v898_v45 = vld [vmem:[#allocation7 + $0x58] sm:$0xff] }
 0x2e0   :  { %1336 = vmatprep.subr.mxu1 %v772_v1 }
 0x2e1   :  { %1337 = vmatpush3.msra.mxu1 %v772_v1 }
 0x2e2   :  { %1338 = vmatprep.subr.mxu1 %v771_v2 }
 0x2e3   :  { %1339 = vmatpush3.msra.mxu1 %v771_v2 }
 0x2e4   :  { %1340 = vmatprep.subr.mxu1 %v770_v3 }
 0x2e5   :  { %1341 = vmatpush3.msra.mxu1 %v770_v3 }
 0x2e6   :  { %1342 = vmatprep.subr.mxu1 %v769_v4 }
 0x2e7   :  { %1343 = vmatpush3.msra.mxu1 %v769_v4 }
 0x2e8   :  { %1344 = vmatprep.subr.mxu1 %v768_v5 }
 0x2e9   :  { %1345 = vmatpush3.msra.mxu1 %v768_v5 }
 0x2ea   :  { %1346 = vmatprep.subr.mxu1 %v767_v7 }
 0x2eb   :  { %1347 = vmatpush3.msra.mxu1 %v767_v7  ;;  %v1029_v7 = vld [vmem:[%s1739_s9] ss:$0 sm:$0xff]  ;;  %s1496_s9 = scalar_lea.vmem %s993_s24, 256 }
 0x2ec   :  { %1348 = vmatprep.subr.mxu1 %v766_v8  ;;  %p1497_p1 = scmp.ne.s32.totalorder %s993_s24, %s1496_s9  ;;  %p1502_p3 = scmp.lt.s32.totalorder %s1496_s9, %s1496_s9 }
 0x2ed   :  { %1349 = vmatpush3.msra.mxu1 %v766_v8 }
 0x2ee   :  { %1350 = vmatprep.subr.mxu1 %v765_v9  ;;  %p1503_p4 = por %p1502_p3, %p1501_p2 }
 0x2ef   :  { %1351 = vmatpush3.msra.mxu1 %v765_v9 }
 0x2f0   :  { %1352 = vmatprep.subr.mxu1 %v764_v10  ;;  %p1504_p5 = pnand %p1503_p4, %p1497_p1 }
 0x2f1   :  { %1353 = vmatpush3.msra.mxu1 %v764_v10 }
 0x2f2   :  { %1354 = vmatprep.subr.mxu1 %v763_v11 }
 0x2f3   :  { %1355 = vmatpush3.msra.mxu1 %v763_v11 }
 0x2f4   :  { %1356 = vmatprep.subr.mxu1 %v762_v12 }
 0x2f5   :  { %1357 = vmatpush3.msra.mxu1 %v762_v12 }
 0x2f6   :  { %1358 = vmatprep.subr.mxu1 %v761_v15 }
 0x2f7   :  { %1359 = vmatpush3.msra.mxu1 %v761_v15 }
 0x2f8   :  { %1360 = vmatprep.subr.mxu1 %v760_v16 }
 0x2f9   :  { %1361 = vmatpush3.msra.mxu1 %v760_v16 }
 0x2fa   :  { %1362 = vmatprep.subr.mxu1 %v759_v17 }
 0x2fb   :  { %1363 = vmatpush3.msra.mxu1 %v759_v17 }
 0x39c   :  { %v1296_v48 = vpop.f32.mrf.mxu1 }
 0x39d   :  { %v595_v49 = vadd.f32 %v1296_v48, %v1018_v14  ;;  %v894_v48 = vld [vmem:[#allocation7 + $0x38] sm:$0xff] }
 0x39e   :  { %v589_v13 = vpop.f32.mrf.mxu1 }
 0x39f   :  { %v1687_v51 = vadd.f32 %v595_v49, %v1657_v38  ;;  %v590_v52 = vadd.f32 %v1018_v14, %v589_v13  ;;  %v895_v14 = vld [vmem:[#allocation7 + $0x40] sm:$0xff]  ;;  %v893_v49 = vld [vmem:[#allocation7 + $0x30] sm:$0xff] }
 0x3a0   :  { %v891_v13 = vld [vmem:[#allocation7 + $0x20] sm:$0xff] }
 0x3a1   :  { %v620_v53 = vmul.f32 %v617_v50, %v1687_v51  ;;  %v1691_v54 = vadd.f32 %v590_v52, %v1661_v41  ;;  %v611_v63 = vmul.f32 %v1021_v59, %v1687_v51  ;;  %v890_v52 = vld [vmem:[#allocation7 + $0x18] sm:$0xff] }
 0x3a3   :  { %1424 = vtanh.f32 %v620_v53  ;;  %v619_v55 = vmul.f32 %v617_v50, %v1691_v54  ;;  %v610_v61 = vmul.f32 %v1021_v59, %v1691_v54  ;;  %v892_v50 = vld [vmem:[#allocation7 + $0x28] sm:$0xff]  ;;  %v889_v53 = vld [vmem:[#allocation7 + $0x10] sm:$0xff]  ;;  %v1028_v59 = vld [vmem:[%s1736_s6 + $0x2] ss:$0 sm:$0xff] }
 0x3a5   :  { %1426 = vtanh.f32 %v619_v55  ;;  %v888_v55 = vld [vmem:[#allocation7 + $0x8] sm:$0xff] }
 0x3b0   :  { %v1425_v56 = vpop.eup %1424 }
 0x3b1   :  { %v624_v57 = vmul.f32 0.5, %v1425_v56  ;;  %v887_v56 = vld [vmem:[#allocation7] sm:$0xff] }
 0x3b2   :  { %v1427_v58 = vpop.eup %1426 }
 0x3b3   :  { %v623_v60 = vmul.f32 0.5, %v1427_v58  ;;  %v626_v38 = vadd.f32 0.5, %v624_v57  ;;  %v861_v57 = vld [vmem:[%s1740_s10] sm:$0x1] }
 0x3b4   :  { %v870_v58 = vmul.f32 0.5, %v861_v57 }
 0x3b5   :  { %v625_v62 = vadd.f32 0.5, %v623_v60  ;;  %v628_v0 = vmul.f32 %v626_v38, %v611_v63 }
 0x3b7   :  { %v627_v41 = vmul.f32 %v625_v62, %v610_v61  ;;  %v875_v61 = vrot.slane %v870_v58, %v1616_v6 }
 0x3b9   :  { %1329 = vmatprep.mubr.f32.mxu0 %v627_v41 }
 0x3ba   :  { %1330 = vmatmul.mubr.f32.vlgmr.msra.gmra.mxu0 %v628_v0 }
 0x3bb   :  { %1368 = vmatpush3.msra.mxu0 %v902_v18 }
 0x3bc   :  { %1369 = vmatprep.subr.mxu0 %v901_v42 }
 0x3bd   :  { %1370 = vmatpush3.msra.mxu0 %v901_v42 }
 0x3be   :  { %1371 = vmatprep.subr.mxu0 %v900_v43 }
 0x3bf   :  { %1372 = vmatpush3.msra.mxu0 %v900_v43 }
 0x3c0   :  { %1373 = vmatprep.subr.mxu0 %v899_v44 }
 0x3c1   :  { %1374 = vmatpush3.msra.mxu0 %v899_v44 }
 0x3c2   :  { %1375 = vmatprep.subr.mxu0 %v898_v45 }
 0x3c3   :  { %1376 = vmatpush3.msra.mxu0 %v898_v45 }
 0x3c4   :  { %1377 = vmatprep.subr.mxu0 %v897_v46 }
 0x3c5   :  { %1378 = vmatpush3.msra.mxu0 %v897_v46 }
 0x3c6   :  { %1379 = vmatprep.subr.mxu0 %v896_v47 }
 0x3c7   :  { %1380 = vmatpush3.msra.mxu0 %v896_v47 }
 0x3c8   :  { %1381 = vmatprep.subr.mxu0 %v895_v14 }
 0x3c9   :  { %1382 = vmatpush3.msra.mxu0 %v895_v14 }
 0x3ca   :  { %1383 = vmatprep.subr.mxu0 %v894_v48 }
 0x3cb   :  { %1384 = vmatpush3.msra.mxu0 %v894_v48 }
 0x3cc   :  { %1385 = vmatprep.subr.mxu0 %v893_v49 }
 0x3cd   :  { %1386 = vmatpush3.msra.mxu0 %v893_v49 }
 0x3ce   :  { %1387 = vmatprep.subr.mxu0 %v892_v50 }
 0x3cf   :  { %1388 = vmatpush3.msra.mxu0 %v892_v50 }
 0x3d0   :  { %1389 = vmatprep.subr.mxu0 %v891_v13 }
 0x3d1   :  { %1390 = vmatpush3.msra.mxu0 %v891_v13 }
 0x3d2   :  { %1391 = vmatprep.subr.mxu0 %v890_v52 }
 0x3d3   :  { %1392 = vmatpush3.msra.mxu0 %v890_v52 }
 0x3d4   :  { %1393 = vmatprep.subr.mxu0 %v889_v53 }
 0x3d5   :  { %1394 = vmatpush3.msra.mxu0 %v889_v53 }
 0x3d6   :  { %1395 = vmatprep.subr.mxu0 %v888_v55 }
 0x3d7   :  { %1396 = vmatpush3.msra.mxu0 %v888_v55 }
 0x3d8   :  { %1397 = vmatprep.subr.mxu0 %v887_v56 }
 0x3d9   :  { %1398 = vmatpush3.msra.mxu0 %v887_v56 }
 0x47a   :  { %v1331_v23 = vpop.f32.mrf.mxu0 }
 0x47b   :  { %v726_v24 = vadd.f32 %v1331_v23, %v1023_v21 }
 0x47c   :  { %v720_v25 = vpop.f32.mrf.mxu0 }
 0x47d   :  { %v749_v26 = vmul.f32 %v746_v22, %v726_v24  ;;  %v721_v27 = vadd.f32 %v1023_v21, %v720_v25  ;;  %v740_v37 = vmul.f32 %v1026_v32, %v726_v24 }
 0x47f   :  { %1428 = vtanh.f32 %v749_v26  ;;  %v748_v28 = vmul.f32 %v746_v22, %v721_v27  ;;  %v739_v35 = vmul.f32 %v1026_v32, %v721_v27 }
 0x481   :  { %1430 = vtanh.f32 %v748_v28 }
 0x48c   :  { %v1429_v29 = vpop.eup %1428 }
 0x48d   :  { %v753_v30 = vmul.f32 0.5, %v1429_v29 }
 0x48e   :  { %v1431_v31 = vpop.eup %1430 }
 0x48f   :  { %v752_v33 = vmul.f32 0.5, %v1431_v31  ;;  %v755_v34 = vadd.f32 0.5, %v753_v30 }
 0x491   :  { %v754_v36 = vadd.f32 0.5, %v752_v33  ;;  %v757_v40 = vmul.f32 %v755_v34, %v740_v37 }
 0x493   :  { %v756_v39 = vmul.f32 %v754_v36, %v739_v35 }
 0x495   :  { %1364 = vmatprep.mubr.f32.mxu1 %v756_v39 }
 0x496   :  { %1365 = vmatmul.mubr.f32.vlgmr.msra.gmra.mxu1 %v757_v40 }
 0x556   :  { %v1366_v60 = vpop.f32.mrf.mxu1 }
 0x557   :  { %v855_v38 = vadd.f32 %v1366_v60, %v1028_v59 }
 0x558   :  { %v849_v62 = vpop.f32.mrf.mxu1 }
 0x559   :  { %v859_v63 = vadd.f32 %v855_v38, %v1687_v51  ;;  %v850_v41 = vadd.f32 %v1028_v59, %v849_v62 }
 0x55b   :  { %v878_v0 = vmul.f32 %v875_v61, %v859_v63  ;;  %v858_v1 = vadd.f32 %v850_v41, %v1691_v54  ;;  %v869_v11 = vmul.f32 %v1029_v7, %v859_v63  ;;  %v1030_v54 = vld [vmem:[%s1742_s12] ss:$0 sm:$0xff] }
 0x55d   :  { %1432 = vtanh.f32 %v878_v0  ;;  %v877_v2 = vmul.f32 %v875_v61, %v858_v1  ;;  %v868_v6 = vmul.f32 %v1029_v7, %v858_v1 }
 0x55f   :  { %1434 = vtanh.f32 %v877_v2 }
 0x56a   :  { %v1433_v3 = vpop.eup %1432 }
 0x56b   :  { %v882_v4 = vmul.f32 0.5, %v1433_v3 }
 0x56c   :  { %v1435_v5 = vpop.eup %1434 }
 0x56d   :  { %v881_v8 = vmul.f32 0.5, %v1435_v5  ;;  %v884_v9 = vadd.f32 0.5, %v882_v4 }
 0x56f   :  { %v883_v10 = vadd.f32 0.5, %v881_v8  ;;  %v886_v12 = vmul.f32 %v884_v9, %v869_v11 }
 0x571   :  { %v885_v51 = vmul.f32 %v883_v10, %v868_v6 }
 0x573   :  { %1399 = vmatprep.mubr.f32.mxu0 %v885_v51 }
 0x574   :  { %1400 = vmatmul.mubr.f32.vlgmr.msra.gmra.mxu0 %v886_v12 }
 0x634   :  { %v1401_v15 = vpop.f32.mrf.mxu0 }
 0x635   :  { %v982_v16 = vadd.f32 %v1401_v15, %v1030_v54 }
 0x636   :  { %v976_v17 = vpop.f32.mrf.mxu0 }
 0x637   :  { %986 = vst [vmem:[#allocation8 + $0x8] sm:$0xff] %v982_v16  ;;  %v977_v18 = vadd.f32 %v1030_v54, %v976_v17 }
 0x639   :  { %985 = vst [vmem:[#allocation8] sm:$0xff] %v977_v18 }
 0x63a   :  { %1507 = shalt.err (!%p1504_p5)
}
 0x63b   :  { %998 = dma.vmem_to_hbm [thread:$0]  %s993_s24, 256, %s1743_s13, [#allocation4], %s1524_s30, %s1524_s30, %s1525_s14  }
 0x63c   :  { %1520 = dma.done.wait [#allocation4], 256  }
 0x63d   :  { %1521 = vsyncadd [#allocation4], 4294967040 }
 0x63e   :  { %1002 = vsyncpa [#allocation3], 1 }
 0x63f   :  { %1003 = vsyncpa [#allocation6], 1 }
 0x640   :  { %1004 = vsyncpa [#allocation4], 1 }

</bundles_post_ra>
